<compile_context>
chip_gen: v7x
topology: tpu7x:2x2x1
jax: 0.10.0
libtpu: 0.0.40
codegen_flags: <defaults>
</compile_context>

<pallas_src>
import functools

import jax
import jax.numpy as jnp
from jax.experimental import pallas as pl
from jax.experimental.pallas import tpu as pltpu


# -----------------------------------------------------------------------------
# Generation-aware tiling plan.
# -----------------------------------------------------------------------------
def _round_up(x, m):
    return (x + m - 1) // m * m


def _vmem_capacity_bytes():
    # v5e/v6e: 128 MiB, v7x: 64 MiB per TensorCore.  Fall back conservatively.
    try:
        cap = int(getattr(pltpu.get_tpu_info(), "vmem_capacity_bytes"))
        if cap > 0:
            return cap
    except Exception:
        pass
    return 64 * 1024 * 1024


def _pick_bt(B, SC, itemsize):
    """Samples per block: smallest divisor of B whose Bt*SC sublane extent is
    dense for the dtype.  Small Bt = finest identity-skip granularity and the
    most grid steps (review item for v7x load balance)."""
    sub_min = 8 if itemsize >= 4 else 16
    for bt in range(1, B + 1):
        if B % bt == 0 and (bt * SC) % sub_min == 0:
            return bt
    return B  # block spans the whole batch axis (always a legal block shape)


def _plan(B, SC, HW, itemsize):
    cap = _vmem_capacity_bytes()
    budget = min(cap // 2, 96 * 1024 * 1024)
    HWp = _round_up(HW, 128)                      # lane-dense, no masked stores
    Bt = _pick_bt(B, SC, itemsize)
    blk = 2 * 2 * Bt * SC * HWp * itemsize        # in+out tiles, double-buffered
    coords_b = 2 * 8 * HWp * 4                    # resident coordinate constant
    TN = 128
    # Larger chunks on the 128 MiB parts; ~12 B/elem covers iota(i32) +
    # compare(i32) + bf16 one-hot + slack (the review's 2-3x intermediate rule).
    for cand in (2048, 1024, 512, 256, 128):
        if HWp % cand == 0 and blk + coords_b + 12 * HWp * cand <= budget:
            TN = cand
            break
    need = blk + coords_b + 12 * HWp * TN + (4 << 20)
    vmem_limit = int(min(max(need, 32 * 1024 * 1024), int(cap * 0.9)))
    return HWp, Bt, TN, vmem_limit


# -----------------------------------------------------------------------------
# Kernel: one grid step == one block of Bt consecutive samples (usually Bt=1).
# -----------------------------------------------------------------------------
def _route_aug_kernel(H, W, HWp, TN, SC, Bt, nchunks,
                      modes_ref, heights_ref, aff_ref, wb_ref, nact_ref,
                      coords_ref, x_ref, o_ref):
    """
    SMEM (scalar prefetch): modes (B,), heights (B,), aff (6B,) f32 inverse
      affine matrices, wb (nblocks,) compacted active-block ids, nact (1,).
    VMEM: coords (8, HWp) resident constant (rows 0/1/2 = centred x, centred y,
      output row index), x/o (Bt*SC, HWp) per-step tiles (o aliases x in HBM).
    """
    i = pl.program_id(0)
    n_active = nact_ref[0]

    # Steps past the active count revisit the last active block (no new DMA);
    # that block's output tile already holds its result, so they do nothing.
    # Step 0 always computes so the final writeback is well defined even when
    # every sample is identity (block 0 is then just copied onto itself).
    @pl.when((i < n_active) | (i == 0))
    def _():
        blk = wb_ref[i]
        row_idx = coords_ref[2:3, :]                       # (1, HWp) output row

        for s in range(Bt):                                # static; Bt is small
            rows = pl.ds(s * SC, SC)
            g = blk * Bt + s
            mode = modes_ref[g]
            is_affine = mode >= 3

            # -- identity / drop / end-of-route: masked copy ------------------
            @pl.when(jnp.logical_not(is_affine))
            def _(rows=rows, g=g, mode=mode):
                img = x_ref[rows, :]                       # (SC, HWp)
                h_f = heights_ref[g].astype(jnp.float32)
                zero = (mode == 1) | ((mode == 2) & (row_idx < h_f))
                o_ref[rows, :] = img * jnp.logical_not(zero).astype(img.dtype)

            # -- affine: nearest-neighbour inverse warp, zero padding ---------
            @pl.when(is_affine)
            def _(rows=rows, g=g):
                # bf16 one-hot gather (exact for 0/1 route maps), f32 accumulate.
                img = x_ref[rows, :].astype(jnp.bfloat16)  # (SC, HWp)
                m00 = aff_ref[6 * g + 0]
                m01 = aff_ref[6 * g + 1]
                m02 = aff_ref[6 * g + 2]
                m10 = aff_ref[6 * g + 3]
                m11 = aff_ref[6 * g + 4]
                m12 = aff_ref[6 * g + 5]
                tx = m02 + (W - 1) * 0.5
                ty = m12 + (H - 1) * 0.5
                # Lane-dense source-pixel index, hoisted out of the chunk loop.
                pix = jax.lax.broadcasted_iota(jnp.int32, (HWp, TN), 0)

                def chunk(start):
                    xc = coords_ref[0:1, pl.ds(start, TN)]     # (1, TN)
                    yc = coords_ref[1:2, pl.ds(start, TN)]
                    src_x = m00 * xc + m01 * yc + tx
                    src_y = m10 * xc + m11 * yc + ty
                    # TODO(synk): floor(x+0.5) vs grid_sample's round-half-even
                    # may differ by one pixel on exact .5 source coordinates.
                    sxn = jnp.floor(src_x + 0.5)
                    syn = jnp.floor(src_y + 0.5)
                    inb = ((sxn >= 0.0) & (sxn <= W - 1.0) &
                           (syn >= 0.0) & (syn <= H - 1.0))
                    sxi = jnp.clip(sxn, 0.0, W - 1.0).astype(jnp.int32)
                    syi = jnp.clip(syn, 0.0, H - 1.0).astype(jnp.int32)
                    src_flat = jnp.where(inb, syi * W + sxi, -1)   # (1, TN)
                    sel = (pix == src_flat).astype(jnp.bfloat16)   # (HWp, TN)
                    warped = jnp.dot(img, sel,
                                     preferred_element_type=jnp.float32)
                    o_ref[rows, pl.ds(start, TN)] = warped.astype(o_ref.dtype)

                if nchunks <= 8:
                    for n in range(nchunks):               # static full unroll
                        chunk(n * TN)
                else:
                    def body(n, c):
                        chunk(pl.multiple_of(n * TN, TN))
                        return c
                    jax.lax.fori_loop(0, nchunks, body, 0,
                                      unroll=2 if nchunks % 2 == 0 else 1)


# -----------------------------------------------------------------------------
# pallas_call wrapper.
# -----------------------------------------------------------------------------
def _route_aug_pallas(x2, modes, heights, affmat, work_blocks, nact, coords,
                      H, W, HWp, SC, Bt, TN, vmem_limit):
    BSC, _ = x2.shape
    nblocks = BSC // (Bt * SC)
    nchunks = HWp // TN
    kernel = functools.partial(_route_aug_kernel, H, W, HWp, TN, SC, Bt, nchunks)
    grid_spec = pltpu.PrefetchScalarGridSpec(
        num_scalar_prefetch=5,       # modes, heights, affmat, work_blocks, nact
        grid=(nblocks,),
        in_specs=[
            pl.BlockSpec((8, HWp), lambda i, m, h, a, wb, na: (0, 0)),
            pl.BlockSpec((Bt * SC, HWp), lambda i, m, h, a, wb, na: (wb[i], 0)),
        ],
        out_specs=pl.BlockSpec((Bt * SC, HWp),
                               lambda i, m, h, a, wb, na: (wb[i], 0)),
    )
    return pl.pallas_call(
        kernel,
        out_shape=jax.ShapeDtypeStruct(x2.shape, x2.dtype),
        grid_spec=grid_spec,
        # Operand order: modes(0) heights(1) aff(2) wb(3) nact(4) coords(5) x(6).
        # Aliasing x onto the output lets never-visited (identity) blocks keep
        # their input bytes with zero kernel-side DMA.
        input_output_aliases={6: 0},
        compiler_params=pltpu.CompilerParams(
            # Sequential order is required by the revisit/skip trick, so the
            # batch axis is "arbitrary" (no 2-TC sharding on v7x); the ~10x HBM
            # saving on identity samples outweighs the lost megacore split.
            dimension_semantics=("arbitrary",),
            vmem_limit_bytes=vmem_limit,
        ),
    )(modes, heights, affmat, work_blocks, nact, coords, x2)


# -----------------------------------------------------------------------------
# Module wrapper (random-parameter sampling + layout plumbing in plain JAX).
# -----------------------------------------------------------------------------
class RouteAugmentation:
    def __init__(self, drop=0.025, end_of_route=0.025, small_rotation=0.025,
                 large_rotation=0.025, degrees=8.0, translate=(0.1, 0.1),
                 scale=(0.95, 1.05), shear=(0.1, 0.1)):
        assert drop + end_of_route + small_rotation + large_rotation <= 1
        self.drop = drop
        self.end_of_route = end_of_route
        self.small_rotation = small_rotation
        self.large_rotation = large_rotation
        self.degrees = float(degrees)
        self.translate = translate
        self.scale = scale
        self.shear = shear

    def __call__(self, batch, key):
        if 'route_map' not in batch:
            return batch
        rm = batch['route_map']                      # (B, S, C, H, W)
        B, S, C, H, W = rm.shape
        SC, HW = S * C, H * W

        keys = jax.random.split(key, 7)

        # Per-sample branch selection (matches torch.rand(1) thresholds).
        rand_value = jax.random.uniform(keys[0], (B,), dtype=jnp.float32)
        t1 = self.drop
        t2 = t1 + self.end_of_route
        t3 = t2 + self.small_rotation
        t4 = t3 + self.large_rotation
        mode = jnp.where(rand_value < t1, 1,
               jnp.where(rand_value < t2, 2,
               jnp.where(rand_value < t3, 3,
               jnp.where(rand_value < t4, 4, 0)))).astype(jnp.int32)

        height = jax.random.randint(keys[1], (B,), 0, H, dtype=jnp.int32)

        # RandomAffine parameter sampling (torchvision get_params).  Small and
        # large rotation share the RNG stream; only the max angle differs.
        max_deg = jnp.where(mode == 4, 180.0, self.degrees)
        angle = jax.random.uniform(keys[2], (B,), minval=-1.0, maxval=1.0) * max_deg
        max_dx = self.translate[0] * W
        max_dy = self.translate[1] * H
        dx = jnp.round(jax.random.uniform(keys[3], (B,), minval=-max_dx, maxval=max_dx))
        dy = jnp.round(jax.random.uniform(keys[4], (B,), minval=-max_dy, maxval=max_dy))
        scl = jax.random.uniform(keys[5], (B,), minval=self.scale[0], maxval=self.scale[1])
        shear_x = jax.random.uniform(keys[6], (B,), minval=self.shear[0], maxval=self.shear[1])
        shear_y = jnp.zeros((B,), jnp.float32)       # 2-tuple shear => y-shear = 0

        # torchvision _get_inverse_affine_matrix with centre = (0, 0)
        # (tensor path of F.affine; coordinates are image-centre-relative).
        rot = jnp.deg2rad(angle)
        sxr = jnp.deg2rad(shear_x)
        syr = jnp.deg2rad(shear_y)
        a = jnp.cos(rot - syr) / jnp.cos(syr)
        b = -jnp.cos(rot - syr) * jnp.tan(sxr) / jnp.cos(syr) - jnp.sin(rot)
        c = jnp.sin(rot - syr) / jnp.cos(syr)
        d = -jnp.sin(rot - syr) * jnp.tan(sxr) / jnp.cos(syr) + jnp.cos(rot)
        m00 = d / scl
        m01 = -b / scl
        m10 = -c / scl
        m11 = a / scl
        m02 = m00 * (-dx) + m01 * (-dy)
        m12 = m10 * (-dx) + m11 * (-dy)
        affmat = jnp.stack([m00, m01, m02, m10, m11, m12],
                           axis=1).astype(jnp.float32).reshape(-1)   # (6B,)

        # Native dtype when f32/bf16, else f32 (no needless round-trip).
        if rm.dtype in (jnp.dtype(jnp.float32), jnp.dtype(jnp.bfloat16)):
            compute_dtype = rm.dtype
        else:
            compute_dtype = jnp.float32

        HWp, Bt, TN, vmem_limit = _plan(B, SC, HW,
                                        jnp.dtype(compute_dtype).itemsize)

        # Fused (sample*channel, spatial) layout; pad spatial to 128 lanes.
        x2 = rm.reshape(B * SC, HW).astype(compute_dtype)
        if HWp != HW:
            x2 = jnp.pad(x2, ((0, 0), (0, HWp - HW)))

        # Output-pixel coordinates (hoisted constant): centred x/y + row index.
        p = jnp.arange(HWp, dtype=jnp.int32)
        row = (p // W).astype(jnp.float32)
        col = (p % W).astype(jnp.float32)
        coords = jnp.zeros((8, HWp), jnp.float32)
        coords = coords.at[0].set(col - (W - 1) * 0.5)
        coords = coords.at[1].set(row - (H - 1) * 0.5)
        coords = coords.at[2].set(row)

        # Compact the blocks that need any work; pad with the last active block
        # so the trailing grid steps revisit it (no DMA, no compute).
        nblocks = B // Bt
        block_active = jnp.any(mode.reshape(nblocks, Bt) != 0, axis=1)
        order = jnp.argsort(jnp.where(block_active, 0, 1)).astype(jnp.int32)
        n_active = jnp.sum(block_active).astype(jnp.int32)
        last = jnp.where(n_active > 0,
                         order[jnp.clip(n_active - 1, 0, nblocks - 1)],
                         0).astype(jnp.int32)
        pos = jnp.arange(nblocks, dtype=jnp.int32)
        work_blocks = jnp.where(pos < n_active, order, last)
        nact = n_active.reshape(1)

        out2 = _route_aug_pallas(x2, mode, height, affmat, work_blocks, nact,
                                 coords, H, W, HWp, SC, Bt, TN, vmem_limit)
        if HWp != HW:
            out2 = out2[:, :HW]
        out = out2.reshape(B, S, C, H, W).astype(rm.dtype)

        new_batch = dict(batch)
        new_batch['route_map'] = out
        return new_batch


# -----------------------------------------------------------------------------
if __name__ == "__main__":
    key = jax.random.PRNGKey(0)
    k_data, k_aug = jax.random.split(key)

    # Small shapes: (B, S, C, H, W) = (4, 8, 1, 16, 16).  Binary route map, as
    # in the real module (also makes the bf16 one-hot gather exact).
    B, S, C, H, W = 4, 8, 1, 16, 16
    route_map = (jax.random.uniform(k_data, (B, S, C, H, W)) > 0.8).astype(jnp.float32)
    batch = {'route_map': route_map}

    # Bump the branch probabilities so all augmentation modes can trigger in
    # this tiny deterministic demo (defaults 0.025 would almost always no-op).
    aug = RouteAugmentation(drop=0.25, end_of_route=0.25,
                            small_rotation=0.25, large_rotation=0.25)

    out_batch = jax.jit(aug.__call__)(batch, k_aug)
    out = jax.block_until_ready(out_batch['route_map'])
    assert out.shape == (B, S, C, H, W)
    assert bool(jnp.all(jnp.isfinite(out)))
    print("KERNEL_OK")
</pallas_src>

<mosaic_0001>
module attributes {stable_mosaic.version = 11 : i64} {
  func.func @_route_aug_kernel(%arg0: i32, %arg1: memref<4xi32, #tpu.memory_space<smem>>, %arg2: memref<4xi32, #tpu.memory_space<smem>>, %arg3: memref<24xf32, #tpu.memory_space<smem>>, %arg4: memref<4xi32, #tpu.memory_space<smem>>, %arg5: memref<1xi32, #tpu.memory_space<smem>>, %arg6: memref<8x256xf32, #tpu.memory_space<vmem>>, %arg7: memref<8x256xf32, #tpu.memory_space<vmem>>, %arg8: memref<8x256xf32, #tpu.memory_space<vmem>>) attributes {dimension_semantics = [#tpu.dimension_semantics<arbitrary>], iteration_bounds = array<i64: 4>, scalar_prefetch = 5 : i64, scratch_operands = 0 : i64, tpu.core_type = #tpu.core_type<tc>, window_params = [{pipeline_mode = #tpu.pipeline_mode<synchronous>, transform_indices = @transform_0, window_bounds = array<i64: 8, 256>}, {transform_indices = @transform_1, window_bounds = array<i64: 8, 256>}, {transform_indices = @transform_2, window_bounds = array<i64: 8, 256>}]} {
    %c0 = arith.constant 0 : index
    %0 = memref.load %arg5[%c0] : memref<1xi32, #tpu.memory_space<smem>>
    %1 = arith.cmpi slt, %arg0, %0 : i32
    %c0_i32 = arith.constant 0 : i32
    %2 = arith.cmpi eq, %arg0, %c0_i32 : i32
    %3 = arith.ori %1, %2 : i1
    %4 = arith.extui %3 : i1 to i32
    %c0_i32_0 = arith.constant 0 : i32
    %5 = arith.cmpi ne, %4, %c0_i32_0 : i32
    scf.if %5 {
      %6 = arith.index_cast %arg0 : i32 to index
      %7 = memref.load %arg4[%6] : memref<4xi32, #tpu.memory_space<smem>>
      %c2 = arith.constant 2 : index
      %c0_1 = arith.constant 0 : index
      %8 = vector.load %arg6[%c2, %c0_1] : memref<8x256xf32, #tpu.memory_space<vmem>>, vector<1x256xf32>
      %c1_i32 = arith.constant 1 : i32
      %9 = arith.muli %7, %c1_i32 : i32
      %c0_i32_2 = arith.constant 0 : i32
      %10 = arith.addi %9, %c0_i32_2 : i32
      %11 = arith.index_cast %10 : i32 to index
      %12 = memref.load %arg1[%11] : memref<4xi32, #tpu.memory_space<smem>>
      %c3_i32 = arith.constant 3 : i32
      %13 = arith.cmpi sge, %12, %c3_i32 : i32
      %true = arith.constant true
      %14 = arith.xori %13, %true : i1
      %15 = arith.extui %14 : i1 to i32
      %c0_i32_3 = arith.constant 0 : i32
      %16 = arith.cmpi ne, %15, %c0_i32_3 : i32
      scf.if %16 {
        %c0_5 = arith.constant 0 : index
        %c0_6 = arith.constant 0 : index
        %19 = vector.load %arg7[%c0_5, %c0_6] : memref<8x256xf32, #tpu.memory_space<vmem>>, vector<8x256xf32>
        %20 = arith.index_cast %10 : i32 to index
        %21 = memref.load %arg2[%20] : memref<4xi32, #tpu.memory_space<smem>>
        %22 = arith.sitofp %21 : i32 to f32
        %c1_i32_7 = arith.constant 1 : i32
        %23 = arith.cmpi eq, %12, %c1_i32_7 : i32
        %c2_i32 = arith.constant 2 : i32
        %24 = arith.cmpi eq, %12, %c2_i32 : i32
        %25 = vector.broadcast %22 : f32 to vector<1x256xf32>
        %26 = arith.cmpf olt, %8, %25 : vector<1x256xf32>
        %27 = vector.broadcast %24 : i1 to vector<1x256xi1>
        %28 = arith.andi %27, %26 : vector<1x256xi1>
        %29 = vector.broadcast %23 : i1 to vector<1x256xi1>
        %30 = arith.ori %29, %28 : vector<1x256xi1>
        %cst = arith.constant dense<true> : vector<1x256xi1>
        %31 = arith.xori %30, %cst : vector<1x256xi1>
        %32 = arith.extui %31 : vector<1x256xi1> to vector<1x256xi32>
        %33 = arith.sitofp %32 : vector<1x256xi32> to vector<1x256xf32>
        %34 = vector.broadcast %33 : vector<1x256xf32> to vector<8x256xf32>
        %35 = arith.mulf %19, %34 : vector<8x256xf32>
        %c0_8 = arith.constant 0 : index
        %c0_9 = arith.constant 0 : index
        %36 = vector.load %arg8[%c0_8, %c0_9] : memref<8x256xf32, #tpu.memory_space<vmem>>, vector<8x256xf32>
        tpu.vector_store %arg8[%c0_8, %c0_9], %35 {strides = array<i32>} : memref<8x256xf32, #tpu.memory_space<vmem>>, vector<8x256xf32>,
      } else {
      }
      %17 = arith.extui %13 : i1 to i32
      %c0_i32_4 = arith.constant 0 : i32
      %18 = arith.cmpi ne, %17, %c0_i32_4 : i32
      scf.if %18 {
        %c0_5 = arith.constant 0 : index
        %c0_6 = arith.constant 0 : index
        %19 = vector.load %arg7[%c0_5, %c0_6] : memref<8x256xf32, #tpu.memory_space<vmem>>, vector<8x256xf32>
        %20 = arith.truncf %19 : vector<8x256xf32> to vector<8x256xbf16>
        %c6_i32 = arith.constant 6 : i32
        %21 = arith.muli %c6_i32, %10 : i32
        %c0_i32_7 = arith.constant 0 : i32
        %22 = arith.addi %21, %c0_i32_7 : i32
        %23 = arith.index_cast %22 : i32 to index
        %24 = memref.load %arg3[%23] : memref<24xf32, #tpu.memory_space<smem>>
        %c6_i32_8 = arith.constant 6 : i32
        %25 = arith.muli %c6_i32_8, %10 : i32
        %c1_i32_9 = arith.constant 1 : i32
        %26 = arith.addi %25, %c1_i32_9 : i32
        %27 = arith.index_cast %26 : i32 to index
        %28 = memref.load %arg3[%27] : memref<24xf32, #tpu.memory_space<smem>>
        %c6_i32_10 = arith.constant 6 : i32
        %29 = arith.muli %c6_i32_10, %10 : i32
        %c2_i32 = arith.constant 2 : i32
        %30 = arith.addi %29, %c2_i32 : i32
        %31 = arith.index_cast %30 : i32 to index
        %32 = memref.load %arg3[%31] : memref<24xf32, #tpu.memory_space<smem>>
        %c6_i32_11 = arith.constant 6 : i32
        %33 = arith.muli %c6_i32_11, %10 : i32
        %c3_i32_12 = arith.constant 3 : i32
        %34 = arith.addi %33, %c3_i32_12 : i32
        %35 = arith.index_cast %34 : i32 to index
        %36 = memref.load %arg3[%35] : memref<24xf32, #tpu.memory_space<smem>>
        %c6_i32_13 = arith.constant 6 : i32
        %37 = arith.muli %c6_i32_13, %10 : i32
        %c4_i32 = arith.constant 4 : i32
        %38 = arith.addi %37, %c4_i32 : i32
        %39 = arith.index_cast %38 : i32 to index
        %40 = memref.load %arg3[%39] : memref<24xf32, #tpu.memory_space<smem>>
        %c6_i32_14 = arith.constant 6 : i32
        %41 = arith.muli %c6_i32_14, %10 : i32
        %c5_i32 = arith.constant 5 : i32
        %42 = arith.addi %41, %c5_i32 : i32
        %43 = arith.index_cast %42 : i32 to index
        %44 = memref.load %arg3[%43] : memref<24xf32, #tpu.memory_space<smem>>
        %cst = arith.constant 7.500000e+00 : f32
        %45 = arith.addf %32, %cst : f32
        %cst_15 = arith.constant 7.500000e+00 : f32
        %46 = arith.addf %44, %cst_15 : f32
        %47 = tpu.iota {dimensions = array<i32: 0>} : vector<256x256xi32>
        %c0_16 = arith.constant 0 : index
        %c0_17 = arith.constant 0 : index
        %48 = vector.load %arg6[%c0_16, %c0_17] : memref<8x256xf32, #tpu.memory_space<vmem>>, vector<1x256xf32>
        %c1 = arith.constant 1 : index
        %c0_18 = arith.constant 0 : index
        %49 = vector.load %arg6[%c1, %c0_18] : memref<8x256xf32, #tpu.memory_space<vmem>>, vector<1x256xf32>
        %50 = vector.broadcast %24 : f32 to vector<1x256xf32>
        %51 = arith.mulf %50, %48 : vector<1x256xf32>
        %52 = vector.broadcast %28 : f32 to vector<1x256xf32>
        %53 = arith.mulf %52, %49 : vector<1x256xf32>
        %54 = arith.addf %51, %53 : vector<1x256xf32>
        %55 = vector.broadcast %45 : f32 to vector<1x256xf32>
        %56 = arith.addf %54, %55 : vector<1x256xf32>
        %57 = vector.broadcast %36 : f32 to vector<1x256xf32>
        %58 = arith.mulf %57, %48 : vector<1x256xf32>
        %59 = vector.broadcast %40 : f32 to vector<1x256xf32>
        %60 = arith.mulf %59, %49 : vector<1x256xf32>
        %61 = arith.addf %58, %60 : vector<1x256xf32>
        %62 = vector.broadcast %46 : f32 to vector<1x256xf32>
        %63 = arith.addf %61, %62 : vector<1x256xf32>
        %cst_19 = arith.constant 5.000000e-01 : f32
        %64 = vector.broadcast %cst_19 : f32 to vector<1x256xf32>
        %65 = arith.addf %56, %64 : vector<1x256xf32>
        %66 = math.floor %65 : vector<1x256xf32>
        %cst_20 = arith.constant 5.000000e-01 : f32
        %67 = vector.broadcast %cst_20 : f32 to vector<1x256xf32>
        %68 = arith.addf %63, %67 : vector<1x256xf32>
        %69 = math.floor %68 : vector<1x256xf32>
        %cst_21 = arith.constant 0.000000e+00 : f32
        %70 = vector.broadcast %cst_21 : f32 to vector<1x256xf32>
        %71 = arith.cmpf oge, %66, %70 : vector<1x256xf32>
        %cst_22 = arith.constant 1.500000e+01 : f32
        %72 = vector.broadcast %cst_22 : f32 to vector<1x256xf32>
        %73 = arith.cmpf ole, %66, %72 : vector<1x256xf32>
        %74 = arith.andi %71, %73 : vector<1x256xi1>
        %cst_23 = arith.constant 0.000000e+00 : f32
        %75 = vector.broadcast %cst_23 : f32 to vector<1x256xf32>
        %76 = arith.cmpf oge, %69, %75 : vector<1x256xf32>
        %77 = arith.andi %74, %76 : vector<1x256xi1>
        %cst_24 = arith.constant 1.500000e+01 : f32
        %78 = vector.broadcast %cst_24 : f32 to vector<1x256xf32>
        %79 = arith.cmpf ole, %69, %78 : vector<1x256xf32>
        %80 = arith.andi %77, %79 : vector<1x256xi1>
        %cst_25 = arith.constant 0.000000e+00 : f32
        %cst_26 = arith.constant 1.500000e+01 : f32
        %81 = vector.broadcast %cst_25 : f32 to vector<1x256xf32>
        %82 = arith.maximumf %81, %66 : vector<1x256xf32>
        %83 = vector.broadcast %cst_26 : f32 to vector<1x256xf32>
        %84 = arith.minimumf %83, %82 : vector<1x256xf32>
        %85 = arith.fptosi %84 : vector<1x256xf32> to vector<1x256xi32>
        %cst_27 = arith.constant 0.000000e+00 : f32
        %cst_28 = arith.constant 1.500000e+01 : f32
        %86 = vector.broadcast %cst_27 : f32 to vector<1x256xf32>
        %87 = arith.maximumf %86, %69 : vector<1x256xf32>
        %88 = vector.broadcast %cst_28 : f32 to vector<1x256xf32>
        %89 = arith.minimumf %88, %87 : vector<1x256xf32>
        %90 = arith.fptosi %89 : vector<1x256xf32> to vector<1x256xi32>
        %c16_i32 = arith.constant 16 : i32
        %91 = vector.broadcast %c16_i32 : i32 to vector<1x256xi32>
        %92 = arith.muli %90, %91 : vector<1x256xi32>
        %93 = arith.addi %92, %85 : vector<1x256xi32>
        %c-1_i32 = arith.constant -1 : i32
        %94 = vector.broadcast %c-1_i32 : i32 to vector<1x256xi32>
        %95 = arith.select %80, %93, %94 : vector<1x256xi1>, vector<1x256xi32>
        %96 = vector.broadcast %95 : vector<1x256xi32> to vector<256x256xi32>
        %97 = arith.cmpi eq, %47, %96 : vector<256x256xi32>
        %98 = arith.extui %97 : vector<256x256xi1> to vector<256x256xi32>
        %99 = arith.sitofp %98 : vector<256x256xi32> to vector<256x256xf32>
        %100 = arith.truncf %99 : vector<256x256xf32> to vector<256x256xbf16>
        %cst_29 = arith.constant dense<0.000000e+00> : vector<8x256xf32>
        %101 = tpu.matmul %20, %100, %cst_29 {dimension_numbers = #tpu.dot_dimension_numbers<[1], [0], [0], [1], [0, 0, 1, 1], [], []>} : vector<8x256xbf16>, vector<256x256xbf16>, vector<8x256xf32> -> vector<8x256xf32>
        %c0_30 = arith.constant 0 : index
        %c0_31 = arith.constant 0 : index
        %102 = vector.load %arg8[%c0_30, %c0_31] : memref<8x256xf32, #tpu.memory_space<vmem>>, vector<8x256xf32>
        tpu.vector_store %arg8[%c0_30, %c0_31], %101 {strides = array<i32>} : memref<8x256xf32, #tpu.memory_space<vmem>>, vector<8x256xf32>,
      } else {
      }
    } else {
    }
    return
  }
  func.func @transform_0(%arg0: i32, %arg1: memref<4xi32, #tpu.memory_space<smem>>, %arg2: memref<4xi32, #tpu.memory_space<smem>>, %arg3: memref<24xf32, #tpu.memory_space<smem>>, %arg4: memref<4xi32, #tpu.memory_space<smem>>, %arg5: memref<1xi32, #tpu.memory_space<smem>>) -> (i32, i32) {
    %c0_i32 = arith.constant 0 : i32
    %c0_i32_0 = arith.constant 0 : i32
    %c0_i32_1 = arith.constant 0 : i32
    return %c0_i32, %c0_i32_0 : i32, i32
  }
  func.func @transform_1(%arg0: i32, %arg1: memref<4xi32, #tpu.memory_space<smem>>, %arg2: memref<4xi32, #tpu.memory_space<smem>>, %arg3: memref<24xf32, #tpu.memory_space<smem>>, %arg4: memref<4xi32, #tpu.memory_space<smem>>, %arg5: memref<1xi32, #tpu.memory_space<smem>>) -> (i32, i32) {
    %0 = arith.index_cast %arg0 : i32 to index
    %1 = memref.load %arg4[%0] : memref<4xi32, #tpu.memory_space<smem>>
    %c0_i32 = arith.constant 0 : i32
    %c0_i32_0 = arith.constant 0 : i32
    return %1, %c0_i32 : i32, i32
  }
  func.func @transform_2(%arg0: i32, %arg1: memref<4xi32, #tpu.memory_space<smem>>, %arg2: memref<4xi32, #tpu.memory_space<smem>>, %arg3: memref<24xf32, #tpu.memory_space<smem>>, %arg4: memref<4xi32, #tpu.memory_space<smem>>, %arg5: memref<1xi32, #tpu.memory_space<smem>>) -> (i32, i32) {
    %0 = arith.index_cast %arg0 : i32 to index
    %1 = memref.load %arg4[%0] : memref<4xi32, #tpu.memory_space<smem>>
    %c0_i32 = arith.constant 0 : i32
    %c0_i32_0 = arith.constant 0 : i32
    return %1, %c0_i32 : i32, i32
  }
}

</mosaic_0001>

<bundles_post_ra>
// kernel: cos.5
= control target key start
LH: loop header
LB: loop body
LE: loop exit
PB: predicated region body
PF: predicated region fallthrough
CT: control target
= control target key end

     0   :  { %v125_v12 = vmov 683565275   ;;  %v126_v14 = vmov 2475754826   ;;  %v127_v16 = vmov 2131351028   ;;  %s168_s0 = inlined_call_operand.vmem [shape: f32[4], index: 0, kind: input, shape index: {}]   ;;  %s169_s1 = inlined_call_operand.vmem [shape: f32[4], index: 1, kind: output, shape index: {}]  }
   0x1   :  { %v144_v0 = vld [vmem:[%s168_s0] sm:$0x1]  ;;  %v128_v18 = vmov 2102212464   ;;  %v129_v20 = vmov 920167782  }
   0x2   :  { %v6_v1 = vand.u32 2139095040, %v144_v0  ;;  %v3_v3 = vand.u32 2147483647, %v144_v0  ;;  %v130_v27 = vmov 1326507024   ;;  %vm5_vm7 = vcmp.lt.s32.totalorder %v144_v0, 0 }
   0x3   :  { %vm95_vm12 = vweird.f32 %v144_v0 }
   0x4   :  { %v7_v2 = vshrl.u32 %v6_v1, 23  ;;  %v10_v6 = vand.u32 8388607, %v3_v3  ;;  %vm4_vm8 = vcmp.le.f32.partialorder %v3_v3, 0.7853982 }
   0x6   :  { %v107_v4 = vadd.s32 4294967169, %v7_v2  ;;  %v11_v9 = vor.u32 8388608, %v10_v6 }
   0x8   :  { %v13_v5 = vadd.s32 1, %v107_v4  ;;  %v51_v29 = vshll.u32 %v11_v9, 8 }
   0xa   :  { %vm14_vm0 = vcmp.gt.s32.totalorder %v13_v5, 0 }
   0xb   :  { %v15_v7 = vsel %vm14_vm0, %v13_v5, 0 }
   0xc   :  { %v17_v8 = vand.u32 31, %v15_v7  ;;  %v16_v10 = vshrl.u32 %v15_v7, 5 }
   0xe   :  { %v18_v11 = vsub.s32 32, %v17_v8  ;;  %v20_v13 = vshll.u32 %v125_v12, %v17_v8  ;;  %v23_v15 = vshll.u32 %v126_v14, %v17_v8  ;;  %v26_v17 = vshll.u32 %v127_v16, %v17_v8 }
   0xf   :  { %v29_v19 = vshll.u32 %v128_v18, %v17_v8  ;;  %v32_v21 = vshll.u32 %v129_v20, %v17_v8  ;;  %vm35_vm1 = vcmp.lt.s32.totalorder %v16_v10, 1  ;;  %vm38_vm2 = vcmp.lt.s32.totalorder %v16_v10, 4 }
  0x10   :  { %v19_v22 = vshrl.u32 %v125_v12, %v18_v11  ;;  %v21_v23 = vshrl.u32 %v126_v14, %v18_v11  ;;  %v24_v24 = vshrl.u32 %v127_v16, %v18_v11  ;;  %v27_v25 = vshrl.u32 %v128_v18, %v18_v11 }
  0x11   :  { %v30_v26 = vshrl.u32 %v129_v20, %v18_v11  ;;  %v33_v28 = vshrl.u32 %v130_v27, %v18_v11  ;;  %vm36_vm3 = vcmp.lt.s32.totalorder %v16_v10, 2  ;;  %vm37_vm4 = vcmp.lt.s32.totalorder %v16_v10, 3 }
  0x12   :  { %v22_v30 = vor.u32 %v21_v23, %v20_v13  ;;  %v25_v31 = vor.u32 %v24_v24, %v23_v15  ;;  %v28_v32 = vor.u32 %v27_v25, %v26_v17 }
  0x13   :  { %v31_v33 = vor.u32 %v30_v26, %v29_v19  ;;  %v34_v34 = vor.u32 %v33_v28, %v32_v21 }
  0x14   :  { %v39_v35 = vsel %vm35_vm1, %v19_v22, %v22_v30  ;;  %v40_v36 = vsel %vm38_vm2, %v28_v32, 2102212464  ;;  %v43_v37 = vsel %vm35_vm1, %v22_v30, %v25_v31  ;;  %v47_v38 = vsel %vm35_vm1, %v25_v31, %v28_v32 }
  0x15   :  { %v41_v39 = vsel %vm37_vm4, %v25_v31, %v40_v36  ;;  %v44_v40 = vsel %vm38_vm2, %v31_v33, 920167782  ;;  %v48_v41 = vsel %vm38_vm2, %v34_v34, 1326507024 }
  0x16   :  { %v45_v42 = vsel %vm37_vm4, %v28_v32, %v44_v40  ;;  %v49_v43 = vsel %vm37_vm4, %v31_v33, %v48_v41  ;;  %v42_v44 = vsel %vm36_vm3, %v39_v35, %v41_v39 }
  0x17   :  { %v46_v45 = vsel %vm36_vm3, %v43_v37, %v45_v42  ;;  %v50_v46 = vsel %vm36_vm3, %v47_v38, %v49_v43  ;;  %v58_v51 = vmul.u32 %v51_v29, %v42_v44 }
  0x18   :  { %v150_v47 = vmul.u32.u64.low %v51_v29, %v50_v46  ;;  %v151_v48 = vmul.u32.u64.high %v51_v29, %v50_v46, %v150_v47  ;;  %v153_v49 = vmul.u32.u64.low %v51_v29, %v46_v45  ;;  %v154_v50 = vmul.u32.u64.high %v51_v29, %v46_v45, %v153_v49 }
  0x1a   :  { %vm60_vm5 = vc.u32 %v151_v48, %v153_v49  ;;  %v61_v52 = vadd.s32 1, %v154_v50  ;;  %v59_v63 = vadd.s32 %v153_v49, %v151_v48 }
  0x1c   :  { %v62_v53 = vsel %vm60_vm5, %v61_v52, %v154_v50 }
  0x1d   :  { %v63_v54 = vadd.s32 %v62_v53, %v58_v51 }
  0x1f   :  { %v64_v55 = vadd.s32 536870912, %v63_v54 }
  0x21   :  { %v65_v56 = vshrl.u32 %v64_v55, 30 }
  0x23   :  { %v66_v57 = vshll.u32 %v65_v56, 30  ;;  %v89_v14 = vsub.s32 4, %v65_v56 }
  0x25   :  { %v67_v58 = vsub.s32 %v63_v54, %v66_v57  ;;  %v90_v17 = vsel %vm5_vm7, %v89_v14, %v65_v56 }
  0x26   :  { %v92_v18 = vsel %vm4_vm8, 0, %v90_v17 }
  0x27   :  { %v69_v59 = vsub.s32 0, %v67_v58  ;;  %v96_v19 = vand.u32 3, %v92_v18 }
  0x29   :  { %v108_v60 = vmin.u32 %v69_v59, %v67_v58  ;;  %vm101_vm9 = vcmp.eq.s32.totalorder %v96_v19, 2  ;;  %vm98_vm10 = vcmp.eq.s32.totalorder %v96_v19, 0  ;;  %vm97_vm11 = vcmp.lt.s32.totalorder %v96_v19, 2 }
  0x2b   :  { %v71_v61 = vclz %v108_v60 }
  0x2d   :  { %v109_v62 = vadd.s32 4294967294, %v71_v61 }
  0x2f   :  { %vm110_vm6 = vcmp.lt.s32.totalorder %v109_v62, 0 }
  0x30   :  { %v74_v1 = vsel %vm110_vm6, 0, %v109_v62 }
  0x31   :  { %v75_v2 = vsub.s32 32, %v74_v1  ;;  %v76_v4 = vshll.u32 %v67_v58, %v74_v1  ;;  %v79_v5 = vsub.s32 4294967266, %v74_v1 }
  0x33   :  { %v77_v6 = vshrl.u32 %v59_v63, %v75_v2  ;;  %v80_v7 = vadd.s32 127, %v79_v5 }
  0x35   :  { %v78_v8 = vor.u32 %v77_v6, %v76_v4  ;;  %v81_v9 = vshll.u32 %v80_v7, 23 }
  0x37   :  { %v82_v10 = vor.u32 4788187, %v81_v9  ;;  %v85_v11 = vcvt.s32.f32 %v78_v8 }
  0x39   :  { %v83_v12 = vand.u32 2147483647, %v82_v10 }
  0x3b   :  { %v86_v13 = vmul.f32 %v85_v11, %v83_v12 }
  0x3d   :  { %v87_v3 = vxor.u32 2147483648, %v86_v13 }
  0x3f   :  { %v88_v15 = vsel %vm5_vm7, %v87_v3, %v86_v13 }
  0x40   :  { %v91_v16 = vsel %vm4_vm8, %v144_v0, %v88_v15 }
  0x41   :  { %121 = vcosq.f32 %v91_v16 }
  0x42   :  { %123 = vsinq.f32 %v91_v16 }
  0x4b   :  { %v122_v20 = vpop.eup %121 }
  0x4c   :  { %v124_v21 = vpop.eup %123  ;;  %v102_v22 = vxor.u32 2147483648, %v122_v20 }
  0x4d   :  { %v99_v23 = vxor.u32 2147483648, %v124_v21 }
  0x4e   :  { %v103_v0 = vsel %vm101_vm9, %v102_v22, %v124_v21 }
  0x4f   :  { %v100_v24 = vsel %vm98_vm10, %v122_v20, %v99_v23 }
  0x50   :  { %v104_v25 = vsel %vm97_vm11, %v100_v24, %v103_v0 }
  0x51   :  { %v105_v26 = vsel %vm95_vm12, nan, %v104_v25 }
  0x52   :  { %106 = vst [vmem:[%s169_s1] sm:$0x1] %v105_v26 }

// kernel: a_call__.1
= control target key start
LH: loop header
LB: loop body
LE: loop exit
PB: predicated region body
PF: predicated region fallthrough
CT: control target
= control target key end

     0   :  { %s1125_s0 = inlined_call_operand.vmem [shape: s32[4], index: 0, kind: input, shape index: {}]   ;;  %s1126_s5 = inlined_call_operand.vmem [shape: f32[8,256], index: 5, kind: input, shape index: {}]   ;;  %s1127_s6 = inlined_call_operand.vmem [shape: f32[32,256], index: 6, kind: input, shape index: {}, may-alias: {6,7}]   ;;  %s1128_s7 = inlined_call_operand.vmem [shape: f32[32,256], index: 7, kind: output, shape index: {}, may-alias: {6,7}]   ;;  %s1129_s1 = inlined_call_operand.vmem [shape: s32[4], index: 1, kind: input, shape index: {}]   ;;  %s1130_s2 = inlined_call_operand.vmem [shape: f32[24], index: 2, kind: input, shape index: {}]   ;;  %s1131_s3 = inlined_call_operand.vmem [shape: s32[4], index: 3, kind: input, shape index: {}]   ;;  %s1132_s4 = inlined_call_operand.<no memory space> [shape: s32[1], index: 4, kind: input, shape index: {}]  }
   0x1   :  { %s12_s26 = sshll.u32 %s1125_s0, 4  ;;  %s16_s29 = sshll.u32 %s1129_s1, 4  ;;  %s13_s26 = int_to_ptr.vmem [resolvable:$true] %s12_s26  ;;  %s17_s29 = int_to_ptr.vmem [resolvable:$true] %s16_s29 }
   0x2   :  { %s819_s30 = scalar_lea.vmem %s13_s26, 16  ;;  %p824_p1 = scmp.lt.s32.totalorder %s13_s26, %s13_s26 }
   0x3   :  { %p820_p0 = scmp.ne.s32.totalorder %s13_s26, %s819_s30  ;;  %p825_p2 = scmp.lt.s32.totalorder %s819_s30, %s819_s30 }
   0x5   :  { %p826_p3 = por %p825_p2, %p824_p1 }
   0x7   :  { %p827_p4 = pnand %p826_p3, %p820_p0 }
   0x9   :  { %830 = shalt.err (!%p827_p4)  }
   0xa   :  { %s877_s8 = smov [#allocation3]   ;;  %s831_s9 = scalar_lea.vmem %s17_s29, 16 }
   0xb   :  { %15 = dma.vmem_to_smem %s13_s26, 16, %s877_s8, [#allocation2] }
   0xc   :  { %p832_p5 = scmp.ne.s32.totalorder %s17_s29, %s831_s9  ;;  %p836_p6 = scmp.lt.s32.totalorder %s17_s29, %s17_s29 }
   0xd   :  { %p837_p7 = scmp.lt.s32.totalorder %s831_s9, %s831_s9 }
   0xf   :  { %p838_p8 = por %p837_p7, %p836_p6 }
  0x11   :  { %p839_p9 = pnand %p838_p8, %p832_p5 }
  0x13   :  { %842 = shalt.err (!%p839_p9)  }
  0x14   :  { %s878_s0 = smov [#allocation4]   ;;  %s20_s11 = sshll.u32 %s1130_s2, 4  ;;  %s21_s11 = int_to_ptr.vmem [resolvable:$true] %s20_s11 }
  0x15   :  { %19 = dma.vmem_to_smem %s17_s29, 16, %s878_s0, [#allocation2] }
  0x16   :  { %s24_s14 = sshll.u32 %s1131_s3, 4  ;;  %s843_s15 = scalar_lea.vmem %s21_s11, 16  ;;  %s25_s14 = int_to_ptr.vmem [resolvable:$true] %s24_s14 }
  0x17   :  { %p844_p10 = scmp.ne.s32.totalorder %s21_s11, %s843_s15  ;;  %p848_p11 = scmp.lt.s32.totalorder %s21_s11, %s21_s11 }
  0x18   :  { %p849_p12 = scmp.lt.s32.totalorder %s843_s15, %s843_s15 }
  0x1a   :  { %p850_p13 = por %p849_p12, %p848_p11 }
  0x1c   :  { %p851_p0 = pnand %p850_p13, %p844_p10 }
  0x1e   :  { %854 = shalt.err (!%p851_p0)  }
  0x1f   :  { %s879_s16 = smov [#allocation5]   ;;  %s855_s17 = scalar_lea.vmem %s25_s14, 16 }
  0x20   :  { %23 = dma.vmem_to_smem %s21_s11, 16, %s879_s16, [#allocation2] }
  0x21   :  { %p856_p1 = scmp.ne.s32.totalorder %s25_s14, %s855_s17  ;;  %p860_p2 = scmp.lt.s32.totalorder %s25_s14, %s25_s14 }
  0x22   :  { %p861_p3 = scmp.lt.s32.totalorder %s855_s17, %s855_s17 }
  0x24   :  { %p862_p4 = por %p861_p3, %p860_p2 }
  0x26   :  { %p863_p5 = pnand %p862_p4, %p856_p1 }
  0x28   :  { %866 = shalt.err (!%p863_p5)  }
  0x29   :  { %s880_s2 = smov [#allocation6]   ;;  %28 = sst [smem:[#allocation7]] %s1132_s4 }
  0x2a   :  { %27 = dma.vmem_to_smem %s25_s14, 16, %s880_s2, [#allocation2] }
  0x2b   :  { %871 = dma.done.wait [#allocation2], 64 }
  0x2c   :  { %872 = vsyncadd [#allocation2], 4294967232 }
  0x2d   :  { %30 = sfence }
  0x2e   :  { %s939_s19 = smov 0  }
  0x2f LB: > { %s654_s20 = sadd.s32 4294967295, %s875_s19   ;;  %p658_p6 = scmp.ge.s32.totalorder %s875_s19, 1  ;;  %s875_s19 = sphi %s939_s19, %s36_s19  }
  0x30   : > { %p142_p7 = scmp.lt.s32.totalorder %s875_s19, 5 }
  0x32   : > { %p143_p8 = pnand %p658_p6, %p142_p7 }
  0x33   : > { %s166_s21 = sld [smem:[#allocation6 + %s654_s20]] (!%p143_p8)  ;;  %p182_p9 = scmp.eq.s32.totalorder (!%p143_p8), %s654_s20, 0 }
  0x34   : > { %146 = sbr.rel (%p143_p8) target bundleno = 417 (0x1a1), region = 28  ;;  %s173_s4 = sld [smem:[#allocation6 + %s654_s20]] (!%p143_p8) }
  0x35   : > { %s180_s22 = sld [smem:[#allocation7]] (!%p143_p8) }
  0x39   : > { %p167_p10 = scmp.lt.s32.totalorder (!%p143_p8), %s166_s21, 3 }
  0x3a   : > { %p174_p11 = scmp.lt.s32.totalorder (!%p143_p8), %s173_s4, 3 }
  0x3b   : > { %p181_p12 = scmp.lt.s32.totalorder %s654_s20, %s180_s22  ;;  %s1134_s21 = smov (!%p167_p10, %s166_s21), 3 }
  0x3c   : > { %s1136_s4 = smov (!%p174_p11, %s173_s4), 3  ;;  %s798_s23 = sshll.u32 %s1134_s21, 4 }
  0x3d   : > { %p183_p13 = por %p182_p9, %p181_p12  ;;  %s950_s26 = scalar_lea.vmem %s1127_s6, %s798_s23 }
  0x3e   : > { %s799_s27 = sshll.u32 %s1136_s4, 4  ;;  %s957_s8 = sld [smem:[#allocation6 + %s654_s20]] (%p183_p13)  ;;  %v663_v0 = vld [vmem:[%s1126_s5 + $0x2] ss:$8 sm:$0x3] (%p183_p13) }
  0x3f   : > { %s955_s30 = scalar_lea.vmem %s1128_s7, %s799_s27  ;;  %186 = sbr.rel (!%p183_p13) target bundleno = 417 (0x1a1), region = 32 }
  0x44   : > { %s963_s1 = sld [smem:[#allocation3 + %s957_s8]] (%p183_p13) }
  0x4a   : > { %p664_p0 = scmp.ge.s32.totalorder %s963_s1, 3 }
  0x4b   : > { %s198_s10 = sld [smem:[#allocation4 + %s957_s8]] (!%p664_p0)  ;;  %p200_p1 = scmp.eq.s32.totalorder (!%p664_p0), %s963_s1, 1  ;;  %v216_v1 = vlaneseq (!%p664_p0)  ;;  %vm881_vm5 = vmmov (!%p664_p0), 1   ;;  %v196_v8 = vld [vmem:[%s950_s26] sm:$0xff] (!%p664_p0)  ;;  %v197_v9 = vld [vmem:[%s950_s26 + $0x8] sm:$0xff] (!%p664_p0)  ;;  %v882_v10 = vmov (!%p664_p0), 0.0  }
  0x4c   : > { %195 = sbr.rel (%p664_p0) target bundleno = 97 (0x61), region = 36  ;;  %p201_p2 = scmp.eq.s32.totalorder (!%p664_p0), %s963_s1, 2 }
  0x4d   : > { %v217_v4 = vshrl.u32 (!%p664_p0), %v216_v1, 7 }
  0x4f   : > { %v218_v6 = vsub.s32 (!%p664_p0), 0, %v217_v4  ;;  %v222_v7 = vsub.s32 (!%p664_p0), 1, %v217_v4 }
  0x51   : > { %s199_s13 = scvt.s32.f32 (!%p664_p0), %s198_s10 }
  0x53   : > { %s208_s11 = scalar_select %p200_p1, 1, 0  ;;  %v202_v5 = vstv %s199_s13 }
  0x54   : > { %s204_s12 = scalar_select %p201_p2, 1, 0  ;;  %vm203_vm2 = vcmp.lt.f32.partialorder %v663_v0, %v202_v5 }
  0x55   : > { %v209_v3 = vstv %s208_s11 }
  0x56   : > { %v205_v2 = vstv %s204_s12  ;;  %vm210_vm1 = vcmp.eq.s32.totalorder %v209_v3, 1 }
  0x57   : > { %vm206_vm0 = vcmp.eq.s32.totalorder %v205_v2, 1 }
  0x58   : > { %vm207_vm3 = vmand %vm206_vm0, %vm203_vm2 }
  0x59   : > { %vm211_vm4 = vmor %vm210_vm1, %vm207_vm3 }
  0x5a   : > { %vm212_vm6 = vmxor %vm211_vm4, %vm881_vm5 }
  0x5b   : > { %v665_v11 = vsel %vm212_vm6, 1.0, %v882_v10 }
  0x5c   : > { %v219_v12 = vrot.slane %v665_v11, %v218_v6  ;;  %v223_v13 = vrot.slane %v665_v11, %v222_v7 }
  0x5e   : > { %v226_v14 = vmul.f32 %v219_v12, %v196_v8  ;;  %v227_v15 = vmul.f32 %v223_v13, %v197_v9 }
  0x60   : > { %228 = vst [vmem:[%s955_s30] sm:$0xff] %v226_v14  ;;  %229 = vst [vmem:[%s955_s30 + $0x8] sm:$0xff] %v227_v15 }
  0x61 PF: > { %p666_p3 = scmp.lt.s32.totalorder %s963_s1, 3 }
  0x62   : > { %s237_s14 = smul.u32 (!%p666_p3), 6, %s957_s8  ;;  %v284_v18 = vld [vmem:[%s1126_s5] ss:$8 sm:$0x3] (!%p666_p3)  ;;  %v251_v41 = vlaneseq (!%p666_p3)  ;;  %v883_v60 = vmov (!%p666_p3), 1.0|1.0  }
  0x63   : > { %232 = sbr.rel (%p666_p3) target bundleno = 417 (0x1a1), region = 40  ;;  %v667_v20 = vld [vmem:[%s1126_s5 + $0x1] ss:$8 sm:$0x3] (!%p666_p3) }
  0x64   : > { %s238_s15 = sld [smem:[#allocation5 + %s237_s14]] (!%p666_p3)  ;;  %s239_s16 = sadd.s32 (!%p666_p3), 1, %s237_s14  ;;  %v982_v45 = vshrl.u32 (!%p666_p3), %v251_v41, 7 }
  0x65   : > { %s240_s17 = sld [smem:[#allocation5 + %s239_s16]] (!%p666_p3)  ;;  %s241_s2 = sadd.s32 (!%p666_p3), 2, %s237_s14 }
  0x66   : > { %s242_s3 = sld [smem:[#allocation5 + %s241_s2]] (!%p666_p3)  ;;  %s243_s18 = sadd.s32 (!%p666_p3), 3, %s237_s14  ;;  %v327_v49 = vsub.s32 (!%p666_p3), 1, %v982_v45  ;;  %v323_v50 = vsub.s32 (!%p666_p3), 0, %v982_v45  ;;  %v253_v52 = vadd.s32 (!%p666_p3), 8, %v982_v45  ;;  %v254_v54 = vadd.s32 (!%p666_p3), 16, %v982_v45 }
  0x67   : > { %v234_v16 = vld [vmem:[%s950_s26 + $0x8] sm:$0xff] (!%p666_p3)  ;;  %s244_s20 = sld [smem:[#allocation5 + %s243_s18]] (!%p666_p3)  ;;  %s245_s21 = sadd.s32 (!%p666_p3), 4, %s237_s14  ;;  %v255_v55 = vadd.s32 (!%p666_p3), 24, %v982_v45  ;;  %v256_v58 = vadd.s32 (!%p666_p3), 32, %v982_v45  ;;  %v257_v59 = vadd.s32 (!%p666_p3), 40, %v982_v45 }
  0x68   : > { %v236_v17 = vpack.c.bf16 (!%p666_p3), %v234_v16, %v234_v16  ;;  %s246_s4 = sld [smem:[#allocation5 + %s245_s21]] (!%p666_p3)  ;;  %s247_s22 = sadd.s32 (!%p666_p3), 5, %s237_s14  ;;  %v258_v61 = vadd.s32 (!%p666_p3), 48, %v982_v45  ;;  %v259_v62 = vadd.s32 (!%p666_p3), 56, %v982_v45  ;;  %v260_v63 = vadd.s32 (!%p666_p3), 64, %v982_v45 }
  0x69   : > { %s248_s23 = sld [smem:[#allocation5 + %s247_s22]] (!%p666_p3)  ;;  %v261_v0 = vadd.s32 (!%p666_p3), 72, %v982_v45  ;;  %v262_v1 = vadd.s32 (!%p666_p3), 80, %v982_v45  ;;  %v263_v2 = vadd.s32 (!%p666_p3), 88, %v982_v45  ;;  %v264_v3 = vadd.s32 (!%p666_p3), 96, %v982_v45 }
  0x6a   : > { %585 = vmatprep.mubr.bf16.mxu0 %v236_v17  ;;  %v287_v19 = vstv %s238_s15  ;;  %v265_v4 = vadd.s32 104, %v982_v45  ;;  %v266_v5 = vadd.s32 112, %v982_v45  ;;  %v267_v6 = vadd.s32 120, %v982_v45 }
  0x6b   : > { %v288_v21 = vmul.f32 %v287_v19, %v284_v18  ;;  %v289_v22 = vstv %s240_s17  ;;  %v268_v7 = vadd.s32 128, %v982_v45  ;;  %v269_v8 = vadd.s32 136, %v982_v45 }
  0x6c   : > { %s249_s29 = sadd.f32 7.5, %s242_s3  ;;  %v290_v23 = vmul.f32 %v667_v20, %v289_v22  ;;  %v270_v9 = vadd.s32 144, %v982_v45  ;;  %v271_v10 = vadd.s32 152, %v982_v45  ;;  %v272_v11 = vadd.s32 160, %v982_v45 }
  0x6d   : > { %v294_v24 = vstv %s244_s20  ;;  %v273_v12 = vadd.s32 168, %v982_v45  ;;  %v274_v13 = vadd.s32 176, %v982_v45  ;;  %v275_v14 = vadd.s32 184, %v982_v45 }
  0x6e   : > { %v291_v25 = vadd.f32 %v290_v23, %v288_v21  ;;  %v292_v26 = vstv %s249_s29  ;;  %v295_v27 = vmul.f32 %v294_v24, %v284_v18  ;;  %v296_v28 = vstv %s246_s4  ;;  %v233_v23 = vld [vmem:[%s950_s26] sm:$0xff] }
  0x6f   : > { %s250_s8 = sadd.f32 7.5, %s248_s23  ;;  %v297_v29 = vmul.f32 %v667_v20, %v296_v28  ;;  %v276_v15 = vadd.s32 192, %v982_v45  ;;  %v277_v16 = vadd.s32 200, %v982_v45  ;;  %v278_v17 = vadd.s32 208, %v982_v45 }
  0x70   : > { %v293_v30 = vadd.f32 %v292_v26, %v291_v25  ;;  %v279_v18 = vadd.s32 216, %v982_v45  ;;  %v280_v19 = vadd.s32 224, %v982_v45  ;;  %v281_v20 = vadd.s32 232, %v982_v45 }
  0x71   : > { %v298_v31 = vadd.f32 %v297_v29, %v295_v27  ;;  %v299_v32 = vstv %s250_s8  ;;  %v282_v21 = vadd.s32 240, %v982_v45  ;;  %v283_v22 = vadd.s32 248, %v982_v45 }
  0x72   : > { %v301_v33 = vadd.f32 0.5, %v293_v30  ;;  %v235_v24 = vpack.c.bf16 %v233_v23, %v233_v23 }
  0x73   : > { %v300_v34 = vadd.f32 %v299_v32, %v298_v31 }
  0x74   : > { %v302_v35 = vfloor.f32 %v301_v33 }
  0x75   : > { %v303_v36 = vadd.f32 0.5, %v300_v34 }
  0x76   : > { %v312_v37 = vmax.f32 %v302_v35, 0.0  ;;  %vm305_vm7 = vcmp.ge.f32.partialorder %v302_v35, 0.0  ;;  %vm306_vm8 = vcmp.le.f32.partialorder %v302_v35, 15.0 }
  0x77   : > { %v304_v38 = vfloor.f32 %v303_v36  ;;  %vm307_vm9 = vmand %vm305_vm7, %vm306_vm8 }
  0x78   : > { %v313_v39 = vmin.f32 %v312_v37, 15.0 }
  0x79   : > { %v315_v40 = vmax.f32 %v304_v38, 0.0  ;;  %vm308_vm10 = vcmp.ge.f32.partialorder %v304_v38, 0.0  ;;  %vm310_vm12 = vcmp.le.f32.partialorder %v304_v38, 15.0 }
  0x7a   : > { %v800_v42 = vtrunc.f32 %v313_v39  ;;  %vm309_vm11 = vmand %vm307_vm9, %vm308_vm10 }
  0x7b   : > { %v316_v43 = vmin.f32 %v315_v40, 15.0  ;;  %vm311_vm13 = vmand %vm309_vm11, %vm310_vm12 }
  0x7c   : > { %v801_v46 = vcvt.f32.s32 %v800_v42 }
  0x7d   : > { %v802_v44 = vtrunc.f32 %v316_v43 }
  0x7f   : > { %v803_v47 = vcvt.f32.s32 %v802_v44 }
  0x81   : > { %v318_v48 = vmul.u32 16, %v803_v47 }
  0x83   : > { %v319_v51 = vadd.s32 %v801_v46, %v318_v48 }
  0x85   : > { %v320_v53 = vsel %vm311_vm13, %v319_v51, 4294967295 }
  0x86   : > { %v989_v56 = vrot.slane %v320_v53, %v327_v49  ;;  %v991_v57 = vrot.slane %v320_v53, %v323_v50 }
  0x88   : > { %vm330_vm14 = vcmp.eq.s32.totalorder %v982_v45, %v989_v56  ;;  %vm332_vm15 = vcmp.eq.s32.totalorder %v253_v52, %v989_v56  ;;  %vm329_vm0 = vcmp.eq.s32.totalorder %v982_v45, %v991_v57  ;;  %vm331_vm1 = vcmp.eq.s32.totalorder %v253_v52, %v991_v57 }
  0x89   : > { %vm732_vm2 = vmpackc.low %vm332_vm15, %vm330_vm14  ;;  %vm334_vm3 = vcmp.eq.s32.totalorder %v254_v54, %v989_v56  ;;  %vm336_vm4 = vcmp.eq.s32.totalorder %v255_v55, %v989_v56  ;;  %vm333_vm5 = vcmp.eq.s32.totalorder %v254_v54, %v991_v57  ;;  %vm335_vm6 = vcmp.eq.s32.totalorder %v255_v55, %v991_v57 }
  0x8a   : > { %733 = vmatprep.subr.msk.bf16.mxu0 %vm732_vm2, %v883_v60  ;;  %vm734_vm7 = vmpackc.low %vm331_vm1, %vm329_vm0  ;;  %vm338_vm8 = vcmp.eq.s32.totalorder %v256_v58, %v989_v56  ;;  %vm340_vm9 = vcmp.eq.s32.totalorder %v257_v59, %v989_v56  ;;  %vm337_vm13 = vcmp.eq.s32.totalorder %v256_v58, %v991_v57  ;;  %vm339_vm14 = vcmp.eq.s32.totalorder %v257_v59, %v991_v57 }
  0x8b   : > { %735 = vmatpush1.bf16.msk.msra.mxu0 %vm734_vm7, %v883_v60  ;;  %vm736_vm10 = vmpackc.low %vm336_vm4, %vm334_vm3  ;;  %vm342_vm15 = vcmp.eq.s32.totalorder %v258_v61, %v989_v56  ;;  %vm344_vm0 = vcmp.eq.s32.totalorder %v259_v62, %v989_v56  ;;  %vm341_vm3 = vcmp.eq.s32.totalorder %v258_v61, %v991_v57  ;;  %vm343_vm4 = vcmp.eq.s32.totalorder %v259_v62, %v991_v57 }
  0x8c   : > { %737 = vmatprep.subr.msk.bf16.mxu0 %vm736_vm10, %v883_v60  ;;  %vm738_vm11 = vmpackc.low %vm335_vm6, %vm333_vm5  ;;  %vm346_vm5 = vcmp.eq.s32.totalorder %v260_v63, %v989_v56  ;;  %vm348_vm6 = vcmp.eq.s32.totalorder %v261_v0, %v989_v56  ;;  %vm347_vm10 = vcmp.eq.s32.totalorder %v261_v0, %v991_v57 }
  0x8d   : > { %vm740_vm12 = vmpackc.low %vm340_vm9, %vm338_vm8  ;;  %vm345_vm9 = vcmp.eq.s32.totalorder %v260_v63, %v991_v57 }
  0x8e   : > { %vm742_vm1 = vmpackc.low %vm339_vm14, %vm337_vm13 }
  0x8f   : > { %739 = vmatpush1.bf16.msk.msra.mxu0 %vm738_vm11, %v883_v60  ;;  %vm744_vm2 = vmpackc.low %vm344_vm0, %vm342_vm15  ;;  %vm350_vm11 = vcmp.eq.s32.totalorder %v262_v1, %v989_v56  ;;  %vm349_vm15 = vcmp.eq.s32.totalorder %v262_v1, %v991_v57  ;;  %vm351_vm0 = vcmp.eq.s32.totalorder %v263_v2, %v991_v57 }
  0x90   : > { %741 = vmatprep.subr.msk.bf16.mxu0 %vm740_vm12, %v883_v60  ;;  %vm746_vm7 = vmpackc.low %vm343_vm4, %vm341_vm3  ;;  %vm352_vm12 = vcmp.eq.s32.totalorder %v263_v2, %v989_v56 }
  0x91   : > { %vm748_vm8 = vmpackc.low %vm348_vm6, %vm346_vm5  ;;  %vm353_vm5 = vcmp.eq.s32.totalorder %v264_v3, %v991_v57  ;;  %vm355_vm6 = vcmp.eq.s32.totalorder %v265_v4, %v991_v57 }
  0x92   : > { %vm750_vm13 = vmpackc.low %vm347_vm10, %vm345_vm9 }
  0x93   : > { %743 = vmatpush1.bf16.msk.msra.mxu0 %vm742_vm1, %v883_v60  ;;  %vm752_vm14 = vmpackc.low %vm352_vm12, %vm350_vm11  ;;  %vm354_vm1 = vcmp.eq.s32.totalorder %v264_v3, %v989_v56  ;;  %vm357_vm11 = vcmp.eq.s32.totalorder %v266_v5, %v991_v57  ;;  %vm359_vm12 = vcmp.eq.s32.totalorder %v267_v6, %v991_v57 }
  0x94   : > { %745 = vmatprep.subr.msk.bf16.mxu0 %vm744_vm2, %v883_v60  ;;  %vm356_vm2 = vcmp.eq.s32.totalorder %v265_v4, %v989_v56  ;;  %vm754_vm3 = vmpackc.low %vm351_vm0, %vm349_vm15 }
  0x95   : > { %vm756_vm4 = vmpackc.low %vm356_vm2, %vm354_vm1  ;;  %vm361_vm1 = vcmp.eq.s32.totalorder %v268_v7, %v991_v57  ;;  %vm363_vm2 = vcmp.eq.s32.totalorder %v269_v8, %v991_v57 }
  0x96   : > { %vm758_vm9 = vmpackc.low %vm355_vm6, %vm353_vm5 }
  0x97   : > { %747 = vmatpush1.bf16.msk.msra.mxu0 %vm746_vm7, %v883_v60  ;;  %vm358_vm7 = vcmp.eq.s32.totalorder %v266_v5, %v989_v56  ;;  %vm762_vm15 = vmpackc.low %vm359_vm12, %vm357_vm11 }
  0x98   : > { %749 = vmatprep.subr.msk.bf16.mxu0 %vm748_vm8, %v883_v60  ;;  %vm360_vm8 = vcmp.eq.s32.totalorder %v267_v6, %v989_v56  ;;  %vm766_vm5 = vmpackc.low %vm363_vm2, %vm361_vm1 }
  0x99   : > { %vm760_vm10 = vmpackc.low %vm360_vm8, %vm358_vm7  ;;  %vm365_vm7 = vcmp.eq.s32.totalorder %v270_v9, %v991_v57  ;;  %vm367_vm8 = vcmp.eq.s32.totalorder %v271_v10, %v991_v57 }
  0x9a   : > { %vm770_vm11 = vmpackc.low %vm367_vm8, %vm365_vm7 }
  0x9b   : > { %751 = vmatpush1.bf16.msk.msra.mxu0 %vm750_vm13, %v883_v60  ;;  %vm362_vm13 = vcmp.eq.s32.totalorder %v268_v7, %v989_v56 }
  0x9c   : > { %753 = vmatprep.subr.msk.bf16.mxu0 %vm752_vm14, %v883_v60  ;;  %vm364_vm14 = vcmp.eq.s32.totalorder %v269_v8, %v989_v56 }
  0x9d   : > { %vm764_vm0 = vmpackc.low %vm364_vm14, %vm362_vm13  ;;  %vm369_vm13 = vcmp.eq.s32.totalorder %v272_v11, %v991_v57  ;;  %vm371_vm14 = vcmp.eq.s32.totalorder %v273_v12, %v991_v57 }
  0x9e   : > { %vm774_vm1 = vmpackc.low %vm371_vm14, %vm369_vm13 }
  0x9f   : > { %755 = vmatpush1.bf16.msk.msra.mxu0 %vm754_vm3, %v883_v60  ;;  %vm366_vm3 = vcmp.eq.s32.totalorder %v270_v9, %v989_v56 }
  0xa0   : > { %757 = vmatprep.subr.msk.bf16.mxu0 %vm756_vm4, %v883_v60  ;;  %vm368_vm4 = vcmp.eq.s32.totalorder %v271_v10, %v989_v56 }
  0xa1   : > { %vm768_vm6 = vmpackc.low %vm368_vm4, %vm366_vm3  ;;  %vm373_vm3 = vcmp.eq.s32.totalorder %v274_v13, %v991_v57  ;;  %vm375_vm4 = vcmp.eq.s32.totalorder %v275_v14, %v991_v57 }
  0xa2   : > { %vm778_vm7 = vmpackc.low %vm375_vm4, %vm373_vm3 }
  0xa3   : > { %759 = vmatpush1.bf16.msk.msra.mxu0 %vm758_vm9, %v883_v60  ;;  %vm370_vm9 = vcmp.eq.s32.totalorder %v272_v11, %v989_v56 }
  0xa4   : > { %761 = vmatprep.subr.msk.bf16.mxu0 %vm760_vm10, %v883_v60  ;;  %vm372_vm10 = vcmp.eq.s32.totalorder %v273_v12, %v989_v56 }
  0xa5   : > { %vm772_vm12 = vmpackc.low %vm372_vm10, %vm370_vm9  ;;  %vm377_vm9 = vcmp.eq.s32.totalorder %v276_v15, %v991_v57  ;;  %vm379_vm10 = vcmp.eq.s32.totalorder %v277_v16, %v991_v57 }
  0xa6   : > { %vm782_vm13 = vmpackc.low %vm379_vm10, %vm377_vm9 }
  0xa7   : > { %763 = vmatpush1.bf16.msk.msra.mxu0 %vm762_vm15, %v883_v60  ;;  %vm374_vm15 = vcmp.eq.s32.totalorder %v274_v13, %v989_v56 }
  0xa8   : > { %765 = vmatprep.subr.msk.bf16.mxu0 %vm764_vm0, %v883_v60  ;;  %vm376_vm0 = vcmp.eq.s32.totalorder %v275_v14, %v989_v56 }
  0xa9   : > { %vm776_vm2 = vmpackc.low %vm376_vm0, %vm374_vm15  ;;  %vm381_vm15 = vcmp.eq.s32.totalorder %v278_v17, %v991_v57  ;;  %vm383_vm0 = vcmp.eq.s32.totalorder %v279_v18, %v991_v57 }
  0xaa   : > { %vm786_vm3 = vmpackc.low %vm383_vm0, %vm381_vm15 }
  0xab   : > { %767 = vmatpush1.bf16.msk.msra.mxu0 %vm766_vm5, %v883_v60  ;;  %vm378_vm5 = vcmp.eq.s32.totalorder %v276_v15, %v989_v56 }
  0xac   : > { %769 = vmatprep.subr.msk.bf16.mxu0 %vm768_vm6, %v883_v60  ;;  %vm380_vm6 = vcmp.eq.s32.totalorder %v277_v16, %v989_v56 }
  0xad   : > { %vm780_vm8 = vmpackc.low %vm380_vm6, %vm378_vm5  ;;  %vm385_vm5 = vcmp.eq.s32.totalorder %v280_v19, %v991_v57  ;;  %vm387_vm6 = vcmp.eq.s32.totalorder %v281_v20, %v991_v57 }
  0xae   : > { %vm790_vm9 = vmpackc.low %vm387_vm6, %vm385_vm5 }
  0xaf   : > { %771 = vmatpush1.bf16.msk.msra.mxu0 %vm770_vm11, %v883_v60  ;;  %vm382_vm11 = vcmp.eq.s32.totalorder %v278_v17, %v989_v56 }
  0xb0   : > { %773 = vmatprep.subr.msk.bf16.mxu0 %vm772_vm12, %v883_v60  ;;  %vm384_vm12 = vcmp.eq.s32.totalorder %v279_v18, %v989_v56 }
  0xb1   : > { %vm784_vm14 = vmpackc.low %vm384_vm12, %vm382_vm11  ;;  %vm389_vm11 = vcmp.eq.s32.totalorder %v282_v21, %v991_v57  ;;  %vm391_vm12 = vcmp.eq.s32.totalorder %v283_v22, %v991_v57 }
  0xb3   : > { %775 = vmatpush1.bf16.msk.msra.mxu0 %vm774_vm1, %v883_v60  ;;  %vm386_vm1 = vcmp.eq.s32.totalorder %v280_v19, %v989_v56 }
  0xb4   : > { %777 = vmatprep.subr.msk.bf16.mxu0 %vm776_vm2, %v883_v60  ;;  %vm388_vm2 = vcmp.eq.s32.totalorder %v281_v20, %v989_v56 }
  0xb5   : > { %vm788_vm4 = vmpackc.low %vm388_vm2, %vm386_vm1 }
  0xb7   : > { %779 = vmatpush1.bf16.msk.msra.mxu0 %vm778_vm7, %v883_v60  ;;  %vm390_vm7 = vcmp.eq.s32.totalorder %v282_v21, %v989_v56 }
  0xb8   : > { %781 = vmatprep.subr.msk.bf16.mxu0 %vm780_vm8, %v883_v60  ;;  %vm392_vm8 = vcmp.eq.s32.totalorder %v283_v22, %v989_v56 }
  0xb9   : > { %vm792_vm10 = vmpackc.low %vm392_vm8, %vm390_vm7 }
  0xbb   : > { %783 = vmatpush1.bf16.msk.msra.mxu0 %vm782_vm13, %v883_v60  ;;  %vm794_vm13 = vmpackc.low %vm391_vm12, %vm389_vm11 }
  0xbc   : > { %785 = vmatprep.subr.msk.bf16.mxu0 %vm784_vm14, %v883_v60 }
  0xbf   : > { %787 = vmatpush1.bf16.msk.msra.mxu0 %vm786_vm3, %v883_v60 }
  0xc0   : > { %789 = vmatprep.subr.msk.bf16.mxu0 %vm788_vm4, %v883_v60 }
  0xc3   : > { %791 = vmatpush1.bf16.msk.msra.mxu0 %vm790_vm9, %v883_v60 }
  0xc4   : > { %793 = vmatprep.subr.msk.bf16.mxu0 %vm792_vm10, %v883_v60 }
  0xc7   : > { %795 = vmatpush1.bf16.msk.msra.mxu0 %vm794_vm13, %v883_v60 }
  0xca   : > { %586 = vmatmul.mubr.bf16.vlgmr.msra.gmra.mrb[0].mxu0 %v235_v24 }
 0x19d   : > { %v587_v25 = vpop.f32.mrb[0].mxu0 }
 0x19e   : > { %594 = vst [vmem:[%s955_s30] sm:$0xff] %v587_v25  ;;  %v589_v26 = vpop.f32.mrb[1].mxu0 }
 0x19f   : > { %595 = vst [vmem:[%s955_s30 + $0x8] sm:$0xff] %v589_v26  ;;  %v591_v27 = vpop.f32.mrb[2].mxu0 }
 0x1a0   : > { %v592_v28 = vpop.f32.mrb[3].mxu0 }
 0x1a1 PF: > { %s36_s19 = sadd.s32 1, %s875_s19  }
 0x1a2   : > { %p33_p4 = scmp.ge.s32.totalorder %s36_s19, 6  }
 0x1a4   :  { %35 = sbr.rel (!%p33_p4) target bundleno = 47 (0x2f), region = 72 }

</bundles_post_ra>
